<compile_context>
chip_gen: v7x
topology: tpu7x:2x2x1
jax: 0.10.0
libtpu: 0.0.40
codegen_flags: <defaults>
</compile_context>

<pallas_src>
import functools

import jax
import jax.numpy as jnp
from jax import lax
from jax.experimental import pallas as pl
from jax.experimental.pallas import tpu as pltpu

BN_EPS = 1e-5
_LANE = 128
_TILE_T_CAP = 16384                        # large lane tiles amortize per-step overhead
_STREAM_BUDGET_BYTES = 24 * 1024 * 1024    # budget for double-buffered streamed tiles


def _choose_tile_t(t_total, cin, cout):
    """Pick the T (lane) tile size.  Returns (tile_t, t_padded)."""
    per_col = 2 * (cin + cout) * 4         # f32 bytes per T column, double-buffered x + out
    budget_t = max(_LANE, (_STREAM_BUDGET_BYTES // per_col) // _LANE * _LANE)
    cap = min(_TILE_T_CAP, budget_t)
    if t_total <= cap:
        return t_total, t_total            # single full-extent block: no padding, no slice
    # Prefer a 128-multiple divisor of T so no padding / trailing slice is needed.
    tt = cap
    while tt > _LANE and t_total % tt != 0:
        tt -= _LANE
    if t_total % tt == 0:
        return tt, t_total
    # Fallback: T has no 128-multiple divisor <= cap -> balanced tiles, minimal zero-pad.
    # (Zero columns contribute exactly 0 to the bias-free BN sums, so no masking needed.)
    ntiles = pl.cdiv(t_total, cap)
    tt = pl.cdiv(pl.cdiv(t_total, ntiles), _LANE) * _LANE
    return tt, ntiles * tt


def _vmem_limit_bytes(cin, cout, tile_t):
    """Scoped-VMEM limit derived from the actual buffers (keeps headroom on v7x 64 MiB)."""
    f32 = 4
    stream = 2 * (cin + cout) * tile_t * f32       # double-buffered x tile + out tile
    resident = 2 * (cout * cin + 4 * cout) * f32   # W, scale, shift, stat blocks
    need = stream + resident + (4 << 20)           # headroom for Mosaic internal scratch
    return int(min(max(need, 16 << 20), 48 << 20))


def _stats_kernel(x_ref, w_ref, sum_ref, sq_ref, *, matmul_dtype):
    # x_ref: (1, Cin, TT)  w_ref: (Cout, Cin)
    # sum_ref / sq_ref: (1, 1, Cout, 1) per-(batch, tile) partials (distinct blocks,
    # fully parallel grid -> megacore-friendly on v7x).
    x = x_ref[0]                                    # (Cin, TT)
    w = w_ref[...]                                  # (Cout, Cin)
    if matmul_dtype is not None:
        x = x.astype(matmul_dtype)
        w = w.astype(matmul_dtype)
    z = lax.dot_general(w, x, (((1,), (0,)), ((), ())),
                        preferred_element_type=jnp.float32)       # (Cout, TT)
    sum_ref[0, 0] = jnp.sum(z, axis=1, keepdims=True)             # (Cout, 1)
    sq_ref[0, 0] = jnp.sum(z * z, axis=1, keepdims=True)


def _apply_kernel(x_ref, w_ref, scale_ref, shift_ref, o_ref, *, matmul_dtype):
    # Recompute z = W @ x (cheaper than round-tripping y through HBM), then fused
    # BN scale/shift + ReLU.  scale/shift: (Cout, 1) resident.
    x = x_ref[0]
    w = w_ref[...]
    if matmul_dtype is not None:
        x = x.astype(matmul_dtype)
        w = w.astype(matmul_dtype)
    z = lax.dot_general(w, x, (((1,), (0,)), ((), ())),
                        preferred_element_type=jnp.float32)       # (Cout, TT)
    o_ref[0] = jnp.maximum(z * scale_ref[...] + shift_ref[...], 0.0).astype(o_ref.dtype)


def linlayer_forward(x, w, b, gamma, beta, *, matmul_dtype=None):
    """x: (B, in_dim, T) float32 -> (B, out_dim, T) float32 (train-mode BN semantics).

    Note: the Linear bias `b` cancels exactly under train-mode BatchNorm
    (y - mean_y == (W@x) - mean(W@x)), so it never enters the kernels.
    """
    del b  # mathematically irrelevant to the forward output in training mode
    B, Cin, T = x.shape
    Cout = w.shape[0]

    TT, T_pad = _choose_tile_t(T, Cin, Cout)
    if T_pad != T:
        # TODO(synk): rare fallback (T with no 128-multiple divisor): zero-pad x and
        # slice the output; the pad columns contribute 0 to the bias-free BN sums.
        x = jnp.pad(x, ((0, 0), (0, 0), (0, T_pad - T)))
    nt = T_pad // TT
    vmem = _vmem_limit_bytes(Cin, Cout, TT)

    # ---------------- pass 1: per-tile BN stat partials (stats only, no y write) ----
    kern1 = functools.partial(_stats_kernel, matmul_dtype=matmul_dtype)
    ysum, ysq = pl.pallas_call(
        kern1,
        out_shape=(
            jax.ShapeDtypeStruct((B, nt, Cout, 1), jnp.float32),
            jax.ShapeDtypeStruct((B, nt, Cout, 1), jnp.float32),
        ),
        grid_spec=pltpu.PrefetchScalarGridSpec(
            num_scalar_prefetch=0,
            grid=(B, nt),
            in_specs=[
                pl.BlockSpec((1, Cin, TT), lambda bi, ti: (bi, 0, ti)),   # streamed x
                pl.BlockSpec((Cout, Cin), lambda bi, ti: (0, 0)),         # resident W
            ],
            out_specs=[
                pl.BlockSpec((1, 1, Cout, 1), lambda bi, ti: (bi, ti, 0, 0)),
                pl.BlockSpec((1, 1, Cout, 1), lambda bi, ti: (bi, ti, 0, 0)),
            ],
        ),
        compiler_params=pltpu.CompilerParams(
            dimension_semantics=("parallel", "parallel"),
            vmem_limit_bytes=vmem,
        ),
        cost_estimate=pl.CostEstimate(
            flops=2 * B * T_pad * Cin * Cout,
            transcendentals=0,
            bytes_accessed=4 * (B * Cin * T_pad + Cin * Cout + 2 * B * nt * Cout),
        ),
    )(x, w)

    # ---------------- tiny BN finalize in plain JAX ---------------------------------
    n = jnp.float32(B * T)                         # padded columns contribute zero
    s = jnp.sum(ysum[:, :, :, 0], axis=(0, 1))     # (Cout,)  sum of z = W@x
    ss = jnp.sum(ysq[:, :, :, 0], axis=(0, 1))     # (Cout,)  sum of z^2
    mean = s / n
    var = jnp.maximum(ss / n - mean * mean, 0.0)   # biased variance (train-mode BN)
    inv = lax.rsqrt(var + jnp.float32(BN_EPS))
    scale = (gamma * inv).reshape(Cout, 1).astype(jnp.float32)
    shift = (beta - mean * gamma * inv).reshape(Cout, 1).astype(jnp.float32)

    # ---------------- pass 2: recompute z, apply scale/shift + ReLU -----------------
    kern2 = functools.partial(_apply_kernel, matmul_dtype=matmul_dtype)
    out = pl.pallas_call(
        kern2,
        out_shape=jax.ShapeDtypeStruct((B, Cout, T_pad), jnp.float32),
        grid_spec=pltpu.PrefetchScalarGridSpec(
            num_scalar_prefetch=0,
            grid=(B, nt),
            in_specs=[
                pl.BlockSpec((1, Cin, TT), lambda bi, ti: (bi, 0, ti)),   # streamed x
                pl.BlockSpec((Cout, Cin), lambda bi, ti: (0, 0)),         # resident W
                pl.BlockSpec((Cout, 1), lambda bi, ti: (0, 0)),           # resident scale
                pl.BlockSpec((Cout, 1), lambda bi, ti: (0, 0)),           # resident shift
            ],
            out_specs=pl.BlockSpec((1, Cout, TT), lambda bi, ti: (bi, 0, ti)),
        ),
        compiler_params=pltpu.CompilerParams(
            dimension_semantics=("parallel", "parallel"),
            vmem_limit_bytes=vmem,
        ),
        cost_estimate=pl.CostEstimate(
            flops=2 * B * T_pad * Cin * Cout,
            transcendentals=0,
            bytes_accessed=4 * (B * Cin * T_pad + Cin * Cout + B * Cout * T_pad + 4 * Cout),
        ),
    )(x, w, scale, shift)

    if T_pad != T:
        out = out[:, :, :T]
    return out


def reference_forward(x, w, b, gamma, beta):
    # Pure-JAX reference mirroring the PyTorch module (train-mode BatchNorm1d).
    y = jnp.einsum('bit,oi->bot', x, w,
                   precision=lax.Precision.HIGHEST) + b[None, :, None]
    mean = jnp.mean(y, axis=(0, 2), keepdims=True)
    var = jnp.mean((y - mean) ** 2, axis=(0, 2), keepdims=True)
    y = (y - mean) / jnp.sqrt(var + BN_EPS)
    y = y * gamma[None, :, None] + beta[None, :, None]
    return jnp.maximum(y, 0.0)


if __name__ == "__main__":
    B, in_dim, T, out_dim = 2, 16, 8, 32

    key = jax.random.PRNGKey(0)
    kx, kw, kb = jax.random.split(key, 3)

    x = jax.random.normal(kx, (B, in_dim, T), dtype=jnp.float32)

    # nn.Linear default init: U(-1/sqrt(in_dim), 1/sqrt(in_dim))
    bound = 1.0 / (in_dim ** 0.5)
    w = jax.random.uniform(kw, (out_dim, in_dim), jnp.float32, -bound, bound)
    b = jax.random.uniform(kb, (out_dim,), jnp.float32, -bound, bound)
    # nn.BatchNorm1d default init: weight=1, bias=0
    gamma = jnp.ones((out_dim,), jnp.float32)
    beta = jnp.zeros((out_dim,), jnp.float32)

    # Round test inputs to bf16-exact values so kernel vs reference agreement does not
    # depend on the backend's default f32-matmul precision (products of bf16-exact
    # operands are exact in f32 on every path).
    x = x.astype(jnp.bfloat16).astype(jnp.float32)
    w = w.astype(jnp.bfloat16).astype(jnp.float32)

    out = jax.block_until_ready(linlayer_forward(x, w, b, gamma, beta))
    ref = reference_forward(x, w, b, gamma, beta)

    assert out.shape == (B, out_dim, T)
    err = float(jnp.max(jnp.abs(out - ref)))
    assert jnp.allclose(out, ref, atol=1e-4, rtol=1e-4), f"max abs err {err}"

    print("KERNEL_OK")
</pallas_src>

<mosaic_0001>
module attributes {stable_mosaic.version = 11 : i64} {
  func.func @_stats_kernel(%arg0: i32, %arg1: i32, %arg2: memref<1x16x8xf32, #tpu.memory_space<vmem>>, %arg3: memref<32x16xf32, #tpu.memory_space<vmem>>, %arg4: memref<1x1x32x1xf32, #tpu.memory_space<vmem>>, %arg5: memref<1x1x32x1xf32, #tpu.memory_space<vmem>>) attributes {dimension_semantics = [#tpu.dimension_semantics<parallel>, #tpu.dimension_semantics<parallel>], iteration_bounds = array<i64: 2, 1>, scalar_prefetch = 0 : i64, scratch_operands = 0 : i64, tpu.core_type = #tpu.core_type<tc>, window_params = [{transform_indices = @transform_0, window_bounds = array<i64: 1, 16, 8>}, {pipeline_mode = #tpu.pipeline_mode<synchronous>, transform_indices = @transform_1, window_bounds = array<i64: 32, 16>}, {transform_indices = @transform_2, window_bounds = array<i64: 1, 1, 32, 1>}, {transform_indices = @transform_3, window_bounds = array<i64: 1, 1, 32, 1>}]} {
    %c0 = arith.constant 0 : index
    %c0_0 = arith.constant 0 : index
    %c0_1 = arith.constant 0 : index
    %0 = vector.load %arg2[%c0, %c0_0, %c0_1] : memref<1x16x8xf32, #tpu.memory_space<vmem>>, vector<1x16x8xf32>
    %1 = vector.shape_cast %0 : vector<1x16x8xf32> to vector<16x8xf32>
    %c0_2 = arith.constant 0 : index
    %c0_3 = arith.constant 0 : index
    %2 = vector.load %arg3[%c0_2, %c0_3] : memref<32x16xf32, #tpu.memory_space<vmem>>, vector<32x16xf32>
    %cst = arith.constant dense<0.000000e+00> : vector<32x8xf32>
    %3 = tpu.matmul %2, %1, %cst {dimension_numbers = #tpu.dot_dimension_numbers<[1], [0], [0], [1], [0, 0, 1, 1], [], []>} : vector<32x16xf32>, vector<16x8xf32>, vector<32x8xf32> -> vector<32x8xf32>
    %cst_4 = arith.constant dense<0.000000e+00> : vector<32xf32>
    %4 = vector.multi_reduction <add>, %3, %cst_4 [1] : vector<32x8xf32> to vector<32xf32>
    %5 = vector.shape_cast %4 : vector<32xf32> to vector<32x1xf32>
    %c0_5 = arith.constant 0 : index
    %c0_6 = arith.constant 0 : index
    %c0_7 = arith.constant 0 : index
    %c0_8 = arith.constant 0 : index
    %6 = vector.load %arg4[%c0_5, %c0_6, %c0_7, %c0_8] : memref<1x1x32x1xf32, #tpu.memory_space<vmem>>, vector<1x1x32x1xf32>
    %7 = vector.shape_cast %6 : vector<1x1x32x1xf32> to vector<32x1xf32>
    %8 = vector.shape_cast %5 : vector<32x1xf32> to vector<1x1x32x1xf32>
    tpu.vector_store %arg4[%c0_5, %c0_6, %c0_7, %c0_8], %8 {strides = array<i32>} : memref<1x1x32x1xf32, #tpu.memory_space<vmem>>, vector<1x1x32x1xf32>,
    %9 = arith.mulf %3, %3 : vector<32x8xf32>
    %cst_9 = arith.constant dense<0.000000e+00> : vector<32xf32>
    %10 = vector.multi_reduction <add>, %9, %cst_9 [1] : vector<32x8xf32> to vector<32xf32>
    %11 = vector.shape_cast %10 : vector<32xf32> to vector<32x1xf32>
    %c0_10 = arith.constant 0 : index
    %c0_11 = arith.constant 0 : index
    %c0_12 = arith.constant 0 : index
    %c0_13 = arith.constant 0 : index
    %12 = vector.load %arg5[%c0_10, %c0_11, %c0_12, %c0_13] : memref<1x1x32x1xf32, #tpu.memory_space<vmem>>, vector<1x1x32x1xf32>
    %13 = vector.shape_cast %12 : vector<1x1x32x1xf32> to vector<32x1xf32>
    %14 = vector.shape_cast %11 : vector<32x1xf32> to vector<1x1x32x1xf32>
    tpu.vector_store %arg5[%c0_10, %c0_11, %c0_12, %c0_13], %14 {strides = array<i32>} : memref<1x1x32x1xf32, #tpu.memory_space<vmem>>, vector<1x1x32x1xf32>,
    return
  }
  func.func @transform_0(%arg0: i32, %arg1: i32) -> (i32, i32, i32) {
    %c0_i32 = arith.constant 0 : i32
    %c0_i32_0 = arith.constant 0 : i32
    return %arg0, %c0_i32, %arg1 : i32, i32, i32
  }
  func.func @transform_1(%arg0: i32, %arg1: i32) -> (i32, i32) {
    %c0_i32 = arith.constant 0 : i32
    %c0_i32_0 = arith.constant 0 : i32
    %c0_i32_1 = arith.constant 0 : i32
    return %c0_i32, %c0_i32_0 : i32, i32
  }
  func.func @transform_2(%arg0: i32, %arg1: i32) -> (i32, i32, i32, i32) {
    %c0_i32 = arith.constant 0 : i32
    %c0_i32_0 = arith.constant 0 : i32
    %c0_i32_1 = arith.constant 0 : i32
    return %arg0, %arg1, %c0_i32, %c0_i32_0 : i32, i32, i32, i32
  }
  func.func @transform_3(%arg0: i32, %arg1: i32) -> (i32, i32, i32, i32) {
    %c0_i32 = arith.constant 0 : i32
    %c0_i32_0 = arith.constant 0 : i32
    %c0_i32_1 = arith.constant 0 : i32
    return %arg0, %arg1, %c0_i32, %c0_i32_0 : i32, i32, i32, i32
  }
}

</mosaic_0001>

<bundles_post_ra>
// kernel: tpu_custom_call.1
= control target key start
LH: loop header
LB: loop body
LE: loop exit
PB: predicated region body
PF: predicated region fallthrough
CT: control target
= control target key end

     0   :  { %s621_s12 = smov 0   ;;  %s623_s13 = smov 0   ;;  %s693_s0 = inlined_call_operand.vmem [shape: f32[2,16,8], index: 0, kind: input, shape index: {}]   ;;  %s694_s1 = inlined_call_operand.vmem [shape: f32[32,16], index: 1, kind: input, shape index: {}]   ;;  %s695_s2 = inlined_call_operand.vmem [shape: f32[2,1,32,1], index: 2, kind: output, shape index: {0}]   ;;  %s696_s3 = inlined_call_operand.vmem [shape: f32[2,1,32,1], index: 3, kind: output, shape index: {1}]  }
   0x1   :  { %s625_s14 = smov 0  }
   0x2 LB: > { %s26_s15 = sadd.s32 1, %s595_s13  ;;  %p515_p0 = scmp.ge.s32.totalorder %s599_s14, 1  ;;  %s599_s14 = sphi %s625_s14, %s14_s14   ;;  %s595_s13 = sphi %s623_s13, %s698_s13   ;;  %s591_s12 = sphi %s621_s12, %s697_s12  }
   0x3   : > { %p28_p1 = scmp.ge.s32.totalorder %s26_s15, 2  ;;  %p161_p2 = scmp.lt.s32.totalorder %s599_s14, 3 }
   0x5   : > { %s700_s15 = smov (%p28_p1, %s26_s15), 0  ;;  %p162_p3 = pnand %p515_p0, %p161_p2 }
   0x6   : > { %p201_p4 = scmp.lt.s32.totalorder (!%p162_p3), %s591_s12, 1  ;;  %v229_v0 = vld [vmem:[%s694_s1] sm:$0xff] (!%p162_p3)  ;;  %vm233_vm0 = vcmask (!%p162_p3), 130048   ;;  %v231_v1 = vld [vmem:[%s694_s1 + $0x10] sm:$0xff] (!%p162_p3)  ;;  %v230_v5 = vld [vmem:[%s694_s1 + $0x8] sm:$0xff] (!%p162_p3)  ;;  %vm331_vm1 = vcmask (!%p162_p3), 64512  }
   0x7   : > { %165 = sbr.rel (%p162_p3) target bundleno = 392 (0x188), region = 28  ;;  %541 = vmatprep.mubr.msk.f32.mxu0 (!%p162_p3), %vm233_vm0, %v229_v0  ;;  %544 = vmatprep.mubr.msk.f32.mxu1 (!%p162_p3), %vm233_vm0, %v231_v1  ;;  %v232_v6 = vld [vmem:[%s694_s1 + $0x18] sm:$0xff] (!%p162_p3)  ;;  %vm344_vm2 = vcmask (!%p162_p3), 7168  }
   0xe   : > { %s702_s12 = smov (!%p201_p4, %s591_s12), 1 }
   0xf   : > { %s528_s20 = sshll.u32 %s702_s12, 4  ;;  %s529_s28 = sshll.u32 %s702_s12, 5 }
  0x10   : > { %s208_s23 = scalar_lea.vmem %s693_s0, %s528_s20  ;;  %s217_s4 = scalar_lea.vmem %s695_s2, %s529_s28 }
  0x11   : > { %v227_v2 = vld [vmem:[%s208_s23] sm:$0xff]  ;;  %v228_v3 = vld [vmem:[%s208_s23 + $0x8] sm:$0xff]  ;;  %s226_s7 = scalar_lea.vmem %s696_s3, %s529_s28 }
  0x12   : > { %v547_v4 = vpack.c.bf16 %v228_v3, %v227_v2 }
  0x14   : > { %548 = vmatprep.subr.bf16.mxu0 %v547_v4  ;;  %551 = vmatprep.subr.bf16.mxu1 %v547_v4 }
  0x15   : > { %550 = vmatpush3.bf16.msra.mxu0 %v547_v4  ;;  %552 = vmatpush3.bf16.msra.mxu1 %v547_v4 }
  0x18   : > { %542 = vmatmul.mubr.msk.f32.vlgmr.msra.gmra.mrb[0].mxu0 %vm233_vm0, %v230_v5  ;;  %545 = vmatmul.mubr.msk.f32.vlgmr.msra.gmra.mrb[0].mxu1 %vm233_vm0, %v232_v6 }
  0xeb   : > { %v543_v7 = vpop.f32.mrb[0].mxu0  ;;  %v546_v8 = vpop.f32.mrb[0].mxu1 }
  0xec   : > { %v312_v9 = vpop.f32.mrb[1].mxu0  ;;  %v322_v10 = vpop.f32.mrb[1].mxu1  ;;  %v341_v11 = vsel %vm331_vm1, %v546_v8, 0.0  ;;  %v335_v12 = vsel %vm331_vm1, %v543_v7, 0.0  ;;  %v350_v13 = vmul.f32 %v543_v7, %v543_v7  ;;  %v352_v17 = vmul.f32 %v546_v8, %v546_v8 }
  0xed   : > { %342 = vadd.xlane.f32.xlu1 %v341_v11  ;;  %336 = vadd.xlane.f32.xlu0 %v335_v12  ;;  %v349_v14 = vmul.f32 %v312_v9, %v312_v9  ;;  %v338_v15 = vsel %vm331_vm1, %v322_v10, 0.0  ;;  %v332_v16 = vsel %vm331_vm1, %v312_v9, 0.0  ;;  %v351_v18 = vmul.f32 %v322_v10, %v322_v10 }
  0xee   : > { %v356_v19 = vsel %vm331_vm1, %v350_v13, 0.0  ;;  %v362_v21 = vsel %vm331_vm1, %v352_v17, 0.0 }
  0xef   : > { %v353_v20 = vsel %vm331_vm1, %v349_v14, 0.0  ;;  %v359_v22 = vsel %vm331_vm1, %v351_v18, 0.0 }
  0xf1   : > { %339 = vadd.xlane.f32.xlu1 %v338_v15  ;;  %333 = vadd.xlane.f32.xlu0 %v332_v16 }
  0xf5   : > { %357 = vadd.xlane.f32.xlu1 %v356_v19  ;;  %354 = vadd.xlane.f32.xlu0 %v353_v20 }
  0xf9   : > { %363 = vadd.xlane.f32.xlu1 %v362_v21  ;;  %360 = vadd.xlane.f32.xlu0 %v359_v22 }
 0x17a   : > { %v343_v23 = vpop.xlane.xlu1 %342  ;;  %v337_v24 = vpop.xlane.xlu0 %336 }
 0x17b   : > { %348 = vst.msk [vmem:[%s217_s4 + $0x18] sm:$0xff] %vm344_vm2, %v343_v23  ;;  %346 = vst.msk [vmem:[%s217_s4 + $0x8] sm:$0xff] %vm344_vm2, %v337_v24 }
 0x17e   : > { %v340_v25 = vpop.xlane.xlu1 %339  ;;  %v334_v26 = vpop.xlane.xlu0 %333 }
 0x17f   : > { %347 = vst.msk [vmem:[%s217_s4 + $0x10] sm:$0xff] %vm344_vm2, %v340_v25  ;;  %345 = vst.msk [vmem:[%s217_s4] sm:$0xff] %vm344_vm2, %v334_v26 }
 0x182   : > { %v358_v27 = vpop.xlane.xlu1 %357  ;;  %v355_v28 = vpop.xlane.xlu0 %354 }
 0x183   : > { %366 = vst.msk [vmem:[%s226_s7 + $0x8] sm:$0xff] %vm344_vm2, %v358_v27  ;;  %365 = vst.msk [vmem:[%s226_s7] sm:$0xff] %vm344_vm2, %v355_v28 }
 0x186   : > { %v364_v29 = vpop.xlane.xlu1 %363  ;;  %v361_v30 = vpop.xlane.xlu0 %360 }
 0x187   : > { %368 = vst.msk [vmem:[%s226_s7 + $0x18] sm:$0xff] %vm344_vm2, %v364_v29  ;;  %367 = vst.msk [vmem:[%s226_s7 + $0x10] sm:$0xff] %vm344_vm2, %v361_v30 }
 0x188 PF: > { %s14_s14 = sadd.s32 1, %s599_s14   ;;  %s697_s12 = smov %s595_s13 }
 0x189   : > { %p11_p5 = scmp.ge.s32.totalorder %s14_s14, 4   ;;  %s698_s13 = smov %s700_s15 }
 0x18b   :  { %13 = sbr.rel (!%p11_p5) target bundleno = 2 (0x2), region = 70 }

</bundles_post_ra>
